<compile_context>
chip_gen: v6e
topology: v6e:2x2x1
jax: 0.10.0
libtpu: 0.0.40
codegen_flags: <defaults>
</compile_context>

<pallas_src>
import math

import jax
import jax.numpy as jnp
from jax.experimental import pallas as pl
from jax.experimental.pallas import tpu as pltpu


def _round_up(x: int, m: int) -> int:
    return ((x + m - 1) // m) * m


def _vmem_capacity_bytes() -> int:
    """Best-effort per-core VMEM capacity; conservative 64 MiB fallback."""
    try:
        return int(pltpu.get_tpu_info().vmem_capacity_bytes)
    except Exception:
        pass
    try:
        kind = jax.devices()[0].device_kind.lower()
        if "v5" in kind or "v6" in kind:
            return 128 << 20
    except Exception:
        pass
    return 64 << 20  # v7x per-TensorCore VMEM (conservative default)


# ----------------------------------------------------------------------------
# Kernel
# ----------------------------------------------------------------------------
def swiglu_kernel(x_ref, wv_ref, w2_ref, o_ref, acc_ref):
    """One (M-tile, H-tile) step of the fused SwiGLU forward.

    x_ref  : [TM, E_pad]            activation tile (constant across h)
    wv_ref : [1, E_pad, 2*TH]       fused [W^T | V^T] tile for this h
    w2_ref : [TH, E_pad]            W2^T tile for this h
    o_ref  : [TM, E_pad]            output tile (written at last h)
    acc_ref: [TM, E_pad] f32        VMEM accumulator
    """
    h = pl.program_id(1)

    @pl.when(h == 0)
    def _init():
        acc_ref[...] = jnp.zeros_like(acc_ref)

    th = w2_ref.shape[0]
    wv = wv_ref[0]                              # [E_pad, 2*TH]
    x = x_ref[...]
    if x.dtype != wv.dtype:                     # keep MXU operands in weight dtype
        x = x.astype(wv.dtype)

    # Fused gate/value matmul: standard [M,K]x[K,N] contraction, f32 accum.
    hwv = jnp.dot(x, wv, preferred_element_type=jnp.float32)   # [TM, 2*TH]
    h_w = hwv[:, :th]
    h_v = hwv[:, th:]
    gate = h_w * jax.nn.sigmoid(h_w)            # SiLU (sigmoid -> EUP slot)
    hidden = (gate * h_v).astype(w2_ref.dtype)  # bf16 weights stay on MXU fast path

    acc_ref[...] += jnp.dot(hidden, w2_ref[...], preferred_element_type=jnp.float32)

    @pl.when(h == pl.num_programs(1) - 1)
    def _store():
        # dropout(p=0.2) in eval mode == identity
        o_ref[...] = acc_ref[...].astype(o_ref.dtype)


# ----------------------------------------------------------------------------
# One-time weight preparation (module init time)
# ----------------------------------------------------------------------------
def prepare_swiglu_weights(w_weight, v_weight, w2_weight, *, th_max: int = 512,
                           compute_dtype=None):
    """Pad, pre-transpose and fuse the PyTorch-layout weights once.

    w_weight, v_weight: [H, E];  w2_weight: [E, H] (nn.Linear layout).
    Returns a dict of kernel-ready arrays + static shape metadata.
    """
    H, E = w_weight.shape
    assert v_weight.shape == (H, E) and w2_weight.shape == (E, H)

    E_pad = _round_up(E, 128)
    if H <= 1024:
        TH = _round_up(H, 128)                  # single resident H tile
    else:
        TH = th_max                             # multiple of 256 (v6e/v7x MXU geometry)
    H_pad = _round_up(H, TH)
    n_h = H_pad // TH

    dtype = compute_dtype if compute_dtype is not None else w_weight.dtype
    # Zero padding is exact for bias-free linears (padded gate cols give 0).
    w_t = jnp.pad(w_weight, ((0, H_pad - H), (0, E_pad - E))).astype(dtype).T   # [E_pad, H_pad]
    v_t = jnp.pad(v_weight, ((0, H_pad - H), (0, E_pad - E))).astype(dtype).T   # [E_pad, H_pad]
    w2_t = jnp.pad(w2_weight, ((0, E_pad - E), (0, H_pad - H))).astype(dtype).T  # [H_pad, E_pad]

    # Fuse gate/value weights per H tile: block h = [W^T[:, hTH:(h+1)TH] | V^T[...]]
    w_blk = w_t.reshape(E_pad, n_h, TH)
    v_blk = v_t.reshape(E_pad, n_h, TH)
    wv = jnp.transpose(jnp.concatenate([w_blk, v_blk], axis=-1), (1, 0, 2))     # [n_h, E_pad, 2*TH]

    return {"wv": wv, "w2t": w2_t, "E": E, "H": H,
            "E_pad": E_pad, "H_pad": H_pad, "TH": TH}


# ----------------------------------------------------------------------------
# Forward
# ----------------------------------------------------------------------------
def swiglu_forward(x, params, *, tm: int = None, training: bool = False):
    """x: [..., E].  params: output of prepare_swiglu_weights."""
    if training:
        # TODO(synk): training-mode stochastic dropout not implemented in the kernel.
        raise NotImplementedError("SwiGLU Pallas kernel implements eval-mode dropout only.")

    E, E_pad = params["E"], params["E_pad"]
    H_pad, TH = params["H_pad"], params["TH"]
    wv, w2t = params["wv"], params["w2t"]
    n_h = H_pad // TH

    orig_shape = x.shape
    assert orig_shape[-1] == E
    M = math.prod(orig_shape[:-1])

    # --- per-generation tile / VMEM sizing --------------------------------
    capacity = _vmem_capacity_bytes()
    tm_pref = tm if tm is not None else (512 if capacity >= (100 << 20) else 256)
    TM = min(tm_pref, _round_up(M, 8))
    M_pad = _round_up(M, TM)
    n_m = M_pad // TM

    act_bytes = x.dtype.itemsize
    wt_bytes = wv.dtype.itemsize
    wt_bufs = 1 if n_h == 1 else 2
    footprint = (
        2 * TM * E_pad * act_bytes              # x tile, 2-deep
        + 2 * TM * E_pad * act_bytes            # out tile, 2-deep
        + wt_bufs * E_pad * 2 * TH * wt_bytes   # fused gate/value tile(s)
        + wt_bufs * TH * E_pad * wt_bytes       # W2^T tile(s)
        + TM * E_pad * 4                        # f32 accumulator
        + 4 * TM * TH * 4                       # f32 intermediates headroom
    )
    vmem_limit = max(int(1.3 * footprint) + (4 << 20), 32 << 20)
    vmem_limit = int(max(min(vmem_limit, capacity - (12 << 20)), 16 << 20))

    # --- input: pad only if misaligned ------------------------------------
    x2d = x.reshape(M, E)
    if M_pad != M or E_pad != E:
        x2d = jnp.pad(x2d, ((0, M_pad - M), (0, E_pad - E)))

    wt_mode = pl.Buffered(1) if n_h == 1 else pl.Buffered(2)

    cost = pl.CostEstimate(
        flops=6 * M_pad * E_pad * H_pad,                      # 3 matmuls worth
        transcendentals=M_pad * H_pad,                        # sigmoid
        bytes_accessed=(2 * M_pad * E_pad * act_bytes
                        + (n_m if n_h > 1 else 1) * 3 * H_pad * E_pad * wt_bytes),
    )

    out2d = pl.pallas_call(
        swiglu_kernel,
        out_shape=jax.ShapeDtypeStruct((M_pad, E_pad), x.dtype),
        grid_spec=pltpu.PrefetchScalarGridSpec(
            num_scalar_prefetch=0,
            grid=(n_m, n_h),                                  # reduction axis last
            in_specs=[
                pl.BlockSpec((TM, E_pad), lambda i, h: (i, 0)),           # x tile
                pl.BlockSpec((1, E_pad, 2 * TH), lambda i, h: (h, 0, 0),  # fused W|V
                             pipeline_mode=wt_mode),
                pl.BlockSpec((TH, E_pad), lambda i, h: (h, 0),            # W2^T
                             pipeline_mode=wt_mode),
            ],
            out_specs=pl.BlockSpec((TM, E_pad), lambda i, h: (i, 0)),
            scratch_shapes=[pltpu.VMEM((TM, E_pad), jnp.float32)],
        ),
        compiler_params=pltpu.CompilerParams(
            dimension_semantics=("parallel", "arbitrary"),
            vmem_limit_bytes=vmem_limit,
        ),
        cost_estimate=cost,
    )(x2d, wv, w2t)

    return out2d[:M, :E].reshape(orig_shape)


def xavier_uniform(key, shape, dtype=jnp.float32):
    """nn.init.xavier_uniform_ for a [fan_out, fan_in] Linear weight."""
    fan_out, fan_in = shape
    a = (6.0 / (fan_in + fan_out)) ** 0.5
    return jax.random.uniform(key, shape, dtype=dtype, minval=-a, maxval=a)


if __name__ == "__main__":
    # Small shapes consistent with the module: batch=2, seq=8, n_embed=48.
    # hidden_size = int(n_embed * (4 * 2/3)) = 128.
    B, T, E = 2, 8, 48
    H = int(E * (4 * (2.0 / 3.0)))  # 128

    key = jax.random.PRNGKey(0)
    kx, kw, kv, kw2 = jax.random.split(key, 4)

    x = jax.random.normal(kx, (B, T, E), dtype=jnp.float32)
    w_weight = xavier_uniform(kw, (H, E))    # self.w.weight
    v_weight = xavier_uniform(kv, (H, E))    # self.v.weight
    w2_weight = xavier_uniform(kw2, (E, H))  # self.w2.weight

    params = prepare_swiglu_weights(w_weight, v_weight, w2_weight)
    out = swiglu_forward(x, params)
    out = jax.block_until_ready(out)

    # Cross-check against a plain-JAX reference of the same math.
    def ref(x):
        hw = x @ w_weight.T
        hv = x @ v_weight.T
        return ((hw * jax.nn.sigmoid(hw)) * hv) @ w2_weight.T

    ref_out = ref(x)
    assert out.shape == (B, T, E)
    assert jnp.allclose(out, ref_out, atol=1e-4, rtol=1e-4), \
        float(jnp.max(jnp.abs(out - ref_out)))

    print("KERNEL_OK")
</pallas_src>

<mosaic_0001>
module attributes {stable_mosaic.version = 11 : i64} {
  func.func @swiglu_kernel(%arg0: i32, %arg1: i32, %arg2: memref<16x128xf32, #tpu.memory_space<vmem>>, %arg3: memref<1x128x256xf32, #tpu.memory_space<vmem>>, %arg4: memref<128x128xf32, #tpu.memory_space<vmem>>, %arg5: memref<16x128xf32, #tpu.memory_space<vmem>>, %arg6: memref<16x128xf32, #tpu.memory_space<vmem>>) attributes {dimension_semantics = [#tpu.dimension_semantics<parallel>, #tpu.dimension_semantics<arbitrary>], iteration_bounds = array<i64: 1, 1>, scalar_prefetch = 0 : i64, scratch_operands = 1 : i64, tpu.core_type = #tpu.core_type<tc>, window_params = [{transform_indices = @transform_0, window_bounds = array<i64: 16, 128>}, {pipeline_mode = #tpu.pipeline_mode<synchronous>, transform_indices = @transform_1, window_bounds = array<i64: 1, 128, 256>}, {pipeline_mode = #tpu.pipeline_mode<synchronous>, transform_indices = @transform_2, window_bounds = array<i64: 128, 128>}, {transform_indices = @transform_3, window_bounds = array<i64: 16, 128>}]} {
    %c0_i32 = arith.constant 0 : i32
    %0 = arith.cmpi eq, %arg1, %c0_i32 : i32
    %1 = arith.extui %0 : i1 to i32
    %c0_i32_0 = arith.constant 0 : i32
    %2 = arith.cmpi ne, %1, %c0_i32_0 : i32
    scf.if %2 {
      %cst_15 = arith.constant 0.000000e+00 : f32
      %24 = vector.broadcast %cst_15 : f32 to vector<16x128xf32>
      %c0_16 = arith.constant 0 : index
      %c0_17 = arith.constant 0 : index
      %25 = vector.load %arg6[%c0_16, %c0_17] : memref<16x128xf32, #tpu.memory_space<vmem>>, vector<16x128xf32>
      tpu.vector_store %arg6[%c0_16, %c0_17], %24 {strides = array<i32>} : memref<16x128xf32, #tpu.memory_space<vmem>>, vector<16x128xf32>,
    } else {
    }
    %c0 = arith.constant 0 : index
    %c0_1 = arith.constant 0 : index
    %c0_2 = arith.constant 0 : index
    %3 = vector.load %arg3[%c0, %c0_1, %c0_2] : memref<1x128x256xf32, #tpu.memory_space<vmem>>, vector<1x128x256xf32>
    %4 = vector.shape_cast %3 : vector<1x128x256xf32> to vector<128x256xf32>
    %c0_3 = arith.constant 0 : index
    %c0_4 = arith.constant 0 : index
    %5 = vector.load %arg2[%c0_3, %c0_4] : memref<16x128xf32, #tpu.memory_space<vmem>>, vector<16x128xf32>
    %cst = arith.constant dense<0.000000e+00> : vector<16x256xf32>
    %6 = tpu.matmul %5, %4, %cst {dimension_numbers = #tpu.dot_dimension_numbers<[1], [0], [0], [1], [0, 0, 1, 1], [], []>} : vector<16x128xf32>, vector<128x256xf32>, vector<16x256xf32> -> vector<16x256xf32>
    %7 = vector.extract_strided_slice %6 {offsets = [0, 0], sizes = [16, 128], strides = [1, 1]} : vector<16x256xf32> to vector<16x128xf32>
    %8 = vector.extract_strided_slice %6 {offsets = [0, 128], sizes = [16, 128], strides = [1, 1]} : vector<16x256xf32> to vector<16x128xf32>
    %9 = arith.negf %7 : vector<16x128xf32>
    %10 = math.exp %9 : vector<16x128xf32>
    %cst_5 = arith.constant 1.000000e+00 : f32
    %11 = vector.broadcast %cst_5 : f32 to vector<16x128xf32>
    %12 = arith.addf %11, %10 : vector<16x128xf32>
    %13 = arith.divf %11, %12 : vector<16x128xf32>
    %14 = arith.mulf %7, %13 : vector<16x128xf32>
    %15 = arith.mulf %14, %8 : vector<16x128xf32>
    %c0_6 = arith.constant 0 : index
    %c0_7 = arith.constant 0 : index
    %16 = vector.load %arg6[%c0_6, %c0_7] : memref<16x128xf32, #tpu.memory_space<vmem>>, vector<16x128xf32>
    %c0_8 = arith.constant 0 : index
    %c0_9 = arith.constant 0 : index
    %17 = vector.load %arg4[%c0_8, %c0_9] : memref<128x128xf32, #tpu.memory_space<vmem>>, vector<128x128xf32>
    %cst_10 = arith.constant dense<0.000000e+00> : vector<16x128xf32>
    %18 = tpu.matmul %15, %17, %cst_10 {dimension_numbers = #tpu.dot_dimension_numbers<[1], [0], [0], [1], [0, 0, 1, 1], [], []>} : vector<16x128xf32>, vector<128x128xf32>, vector<16x128xf32> -> vector<16x128xf32>
    %19 = arith.addf %16, %18 : vector<16x128xf32>
    %c0_11 = arith.constant 0 : index
    %c0_12 = arith.constant 0 : index
    %20 = vector.load %arg6[%c0_11, %c0_12] : memref<16x128xf32, #tpu.memory_space<vmem>>, vector<16x128xf32>
    tpu.vector_store %arg6[%c0_11, %c0_12], %19 {strides = array<i32>} : memref<16x128xf32, #tpu.memory_space<vmem>>, vector<16x128xf32>,
    %c0_i32_13 = arith.constant 0 : i32
    %21 = arith.cmpi eq, %arg1, %c0_i32_13 : i32
    %22 = arith.extui %21 : i1 to i32
    %c0_i32_14 = arith.constant 0 : i32
    %23 = arith.cmpi ne, %22, %c0_i32_14 : i32
    scf.if %23 {
      %c0_15 = arith.constant 0 : index
      %c0_16 = arith.constant 0 : index
      %24 = vector.load %arg6[%c0_15, %c0_16] : memref<16x128xf32, #tpu.memory_space<vmem>>, vector<16x128xf32>
      %c0_17 = arith.constant 0 : index
      %c0_18 = arith.constant 0 : index
      %25 = vector.load %arg5[%c0_17, %c0_18] : memref<16x128xf32, #tpu.memory_space<vmem>>, vector<16x128xf32>
      tpu.vector_store %arg5[%c0_17, %c0_18], %24 {strides = array<i32>} : memref<16x128xf32, #tpu.memory_space<vmem>>, vector<16x128xf32>,
    } else {
    }
    return
  }
  func.func @transform_0(%arg0: i32, %arg1: i32) -> (i32, i32) {
    %c0_i32 = arith.constant 0 : i32
    %c0_i32_0 = arith.constant 0 : i32
    return %arg0, %c0_i32 : i32, i32
  }
  func.func @transform_1(%arg0: i32, %arg1: i32) -> (i32, i32, i32) {
    %c0_i32 = arith.constant 0 : i32
    %c0_i32_0 = arith.constant 0 : i32
    %c0_i32_1 = arith.constant 0 : i32
    return %arg1, %c0_i32, %c0_i32_0 : i32, i32, i32
  }
  func.func @transform_2(%arg0: i32, %arg1: i32) -> (i32, i32) {
    %c0_i32 = arith.constant 0 : i32
    %c0_i32_0 = arith.constant 0 : i32
    return %arg1, %c0_i32 : i32, i32
  }
  func.func @transform_3(%arg0: i32, %arg1: i32) -> (i32, i32) {
    %c0_i32 = arith.constant 0 : i32
    %c0_i32_0 = arith.constant 0 : i32
    return %arg0, %c0_i32 : i32, i32
  }
}

</mosaic_0001>

<bundles_post_ra>
// kernel: tpu_custom_call.1
= control target key start
LH: loop header
LB: loop body
LE: loop exit
PB: predicated region body
PF: predicated region fallthrough
CT: control target
= control target key end

     0   :  { %8 = vsyncpa [#allocation4], 0  ;;  %s521_s0 = inlined_call_operand.hbm [shape: f32[16,128], index: 0, kind: input, shape index: {}]   ;;  %s522_s1 = inlined_call_operand.hbm [shape: f32[1,128,256], index: 1, kind: input, shape index: {}]   ;;  %s523_s2 = inlined_call_operand.hbm [shape: f32[128,128], index: 2, kind: input, shape index: {}]   ;;  %s524_s3 = inlined_call_operand.hbm [shape: f32[16,128], index: 3, kind: output, shape index: {}]  }
   0x1   :  { %9 = vsyncpa [#allocation7], 0 }
   0x2   :  { %10 = vsyncpa [#allocation5], 0  ;;  %s469_s12 = smov [#allocation6]  }
   0x3   :  { %s28_s13 = sshll.u32 %s469_s12, 4  ;;  %s29_s13 = int_to_ptr.vmem [resolvable:$true] %s28_s13 }
   0x4   :  { %s391_s14 = scalar_lea.vmem %s29_s13, 4096  ;;  %p396_p1 = scmp.lt.s32.totalorder %s29_s13, %s29_s13 }
   0x5   :  { %p392_p0 = scmp.ne.s32.totalorder %s29_s13, %s391_s14  ;;  %p397_p2 = scmp.lt.s32.totalorder %s391_s14, %s391_s14 }
   0x7   :  { %p398_p3 = por %p397_p2, %p396_p1 }
   0x9   :  { %p399_p4 = pnand %p398_p3, %p392_p0 }
   0xb   :  { %402 = shalt.err (!%p399_p4)
}
   0xc   :  { %s470_s15 = smov 256   ;;  %s471_s16 = smov 16  }
   0xd   :  { %34 = dma.hbm_to_vmem [thread:$0]  %s522_s1, 4096, %s29_s13, [#allocation7], %s470_s15, %s470_s15, %s471_s16  }
   0xe   :  { %s472_s19 = smov [#allocation3]  }
   0xf   :  { %s16_s20 = sshll.u32 %s472_s19, 4  ;;  %s17_s20 = int_to_ptr.vmem [resolvable:$true] %s16_s20 }
  0x10   :  { %s411_s21 = scalar_lea.vmem %s17_s20, 256  ;;  %p416_p6 = scmp.lt.s32.totalorder %s17_s20, %s17_s20 }
  0x11   :  { %p412_p5 = scmp.ne.s32.totalorder %s17_s20, %s411_s21  ;;  %p417_p7 = scmp.lt.s32.totalorder %s411_s21, %s411_s21 }
  0x13   :  { %p418_p8 = por %p417_p7, %p416_p6 }
  0x15   :  { %p419_p9 = pnand %p418_p8, %p412_p5 }
  0x17   :  { %422 = shalt.err (!%p419_p9)
}
  0x18   :  { %s473_s22 = smov 128   ;;  %s474_s23 = smov 8  }
  0x19   :  { %22 = dma.hbm_to_vmem [thread:$0]  %s521_s0, 256, %s17_s20, [#allocation4], %s473_s22, %s473_s22, %s474_s23  }
  0x1a   :  { %s475_s1 = smov [#allocation8]  }
  0x1b   :  { %s40_s26 = sshll.u32 %s475_s1, 4  ;;  %s41_s26 = int_to_ptr.vmem [resolvable:$true] %s40_s26 }
  0x1c   :  { %s431_s27 = scalar_lea.vmem %s41_s26, 2048  ;;  %p436_p11 = scmp.lt.s32.totalorder %s41_s26, %s41_s26 }
  0x1d   :  { %p432_p10 = scmp.ne.s32.totalorder %s41_s26, %s431_s27  ;;  %p437_p12 = scmp.lt.s32.totalorder %s431_s27, %s431_s27 }
  0x1f   :  { %p438_p13 = por %p437_p12, %p436_p11 }
  0x21   :  { %p439_p0 = pnand %p438_p13, %p432_p10 }
  0x23   :  { %442 = shalt.err (!%p439_p0)
}
  0x24   :  { %46 = dma.hbm_to_vmem [thread:$0]  %s523_s2, 2048, %s41_s26, [#allocation7], %s473_s22, %s473_s22, %s474_s23  }
  0x25   :  { %463 = dma.done.wait [#allocation4], 256  }
  0x26   :  { %464 = vsyncadd [#allocation4], 4294967040 }
  0x27   :  { %465 = dma.done.wait [#allocation7], 6144  }
  0x28   :  { %466 = vsyncadd [#allocation7], 4294961152  ;;  %v476_v0 = vmov 0.0   ;;  %v93_v1 = vld [vmem:[#allocation6 + $0xf8] sm:$0xff]  ;;  %v92_v2 = vld [vmem:[#allocation6 + $0xf0] sm:$0xff]  ;;  %s477_s0 = smov [#allocation9]  }
  0x29   :  { %160 = vmatprep.mubr.f32.mxu0 %v476_v0  ;;  %v91_v3 = vld [vmem:[#allocation6 + $0xe8] sm:$0xff]  ;;  %96 = vmatprep.subr.mxu0 %v93_v1  ;;  %v90_v4 = vld [vmem:[#allocation6 + $0xe0] sm:$0xff]  ;;  %v89_v5 = vld [vmem:[#allocation6 + $0xd8] sm:$0xff]  ;;  %s298_s2 = sshll.u32 %s477_s0, 4  ;;  %s299_s2 = int_to_ptr.vmem [resolvable:$true] %s298_s2 }
  0x2a   :  { %97 = vmatpush1.msra.mxu0 %v92_v2  ;;  %v88_v6 = vld [vmem:[#allocation6 + $0xd0] sm:$0xff]  ;;  %v87_v7 = vld [vmem:[#allocation6 + $0xc8] sm:$0xff]  ;;  %v86_v8 = vld [vmem:[#allocation6 + $0xc0] sm:$0xff]  ;;  %s443_s30 = scalar_lea.vmem %s299_s2, 256  ;;  %p448_p2 = scmp.lt.s32.totalorder %s299_s2, %s299_s2 }
  0x2b   :  { %98 = vmatprep.subr.mxu0 %v91_v3  ;;  %v85_v9 = vld [vmem:[#allocation6 + $0xb8] sm:$0xff]  ;;  %v84_v10 = vld [vmem:[#allocation6 + $0xb0] sm:$0xff]  ;;  %v83_v11 = vld [vmem:[#allocation6 + $0xa8] sm:$0xff]  ;;  %p444_p1 = scmp.ne.s32.totalorder %s299_s2, %s443_s30  ;;  %p449_p3 = scmp.lt.s32.totalorder %s443_s30, %s443_s30 }
  0x2c   :  { %99 = vmatpush1.msra.mxu0 %v90_v4  ;;  %v82_v12 = vld [vmem:[#allocation6 + $0xa0] sm:$0xff]  ;;  %v81_v13 = vld [vmem:[#allocation6 + $0x98] sm:$0xff]  ;;  %v80_v14 = vld [vmem:[#allocation6 + $0x90] sm:$0xff] }
  0x2d   :  { %100 = vmatprep.subr.mxu0 %v89_v5  ;;  %v79_v15 = vld [vmem:[#allocation6 + $0x88] sm:$0xff]  ;;  %v78_v16 = vld [vmem:[#allocation6 + $0x80] sm:$0xff]  ;;  %v77_v17 = vld [vmem:[#allocation6 + $0x78] sm:$0xff]  ;;  %p450_p4 = por %p449_p3, %p448_p2 }
  0x2e   :  { %101 = vmatpush1.msra.mxu0 %v88_v6  ;;  %v76_v18 = vld [vmem:[#allocation6 + $0x70] sm:$0xff]  ;;  %v75_v19 = vld [vmem:[#allocation6 + $0x68] sm:$0xff]  ;;  %v74_v20 = vld [vmem:[#allocation6 + $0x60] sm:$0xff] }
  0x2f   :  { %102 = vmatprep.subr.mxu0 %v87_v7  ;;  %v73_v21 = vld [vmem:[#allocation6 + $0x58] sm:$0xff]  ;;  %v72_v22 = vld [vmem:[#allocation6 + $0x50] sm:$0xff]  ;;  %v71_v23 = vld [vmem:[#allocation6 + $0x48] sm:$0xff]  ;;  %p451_p5 = pnand %p450_p4, %p444_p1 }
  0x30   :  { %103 = vmatpush1.msra.mxu0 %v86_v8  ;;  %v70_v24 = vld [vmem:[#allocation6 + $0x40] sm:$0xff]  ;;  %v69_v25 = vld [vmem:[#allocation6 + $0x38] sm:$0xff]  ;;  %v68_v26 = vld [vmem:[#allocation6 + $0x30] sm:$0xff] }
  0x31   :  { %104 = vmatprep.subr.mxu0 %v85_v9  ;;  %v67_v27 = vld [vmem:[#allocation6 + $0x28] sm:$0xff]  ;;  %v66_v28 = vld [vmem:[#allocation6 + $0x20] sm:$0xff]  ;;  %v65_v29 = vld [vmem:[#allocation6 + $0x18] sm:$0xff] }
  0x32   :  { %105 = vmatpush1.msra.mxu0 %v84_v10  ;;  %v64_v30 = vld [vmem:[#allocation6 + $0x10] sm:$0xff]  ;;  %v63_v31 = vld [vmem:[#allocation6 + $0x8] sm:$0xff]  ;;  %v62_v32 = vld [vmem:[#allocation6] sm:$0xff] }
  0x33   :  { %106 = vmatprep.subr.mxu0 %v83_v11  ;;  %v94_v33 = vld [vmem:[#allocation3] sm:$0xff]  ;;  %v95_v34 = vld [vmem:[#allocation3 + $0x8] sm:$0xff]  ;;  %v204_v37 = vld [vmem:[#allocation8 + $0x68] sm:$0xff] }
  0x34   :  { %107 = vmatpush1.msra.mxu0 %v82_v12  ;;  %v206_v35 = vld [vmem:[#allocation8 + $0x78] sm:$0xff]  ;;  %v205_v36 = vld [vmem:[#allocation8 + $0x70] sm:$0xff]  ;;  %v203_v38 = vld [vmem:[#allocation8 + $0x60] sm:$0xff] }
  0x35   :  { %108 = vmatprep.subr.mxu0 %v81_v13  ;;  %331 = vmatprep.subr.mxu1 %v206_v35  ;;  %v202_v39 = vld [vmem:[#allocation8 + $0x58] sm:$0xff]  ;;  %v201_v40 = vld [vmem:[#allocation8 + $0x50] sm:$0xff]  ;;  %v200_v41 = vld [vmem:[#allocation8 + $0x48] sm:$0xff] }
  0x36   :  { %109 = vmatpush1.msra.mxu0 %v80_v14  ;;  %332 = vmatpush3.msra.mxu1 %v206_v35  ;;  %v199_v42 = vld [vmem:[#allocation8 + $0x40] sm:$0xff]  ;;  %v198_v43 = vld [vmem:[#allocation8 + $0x38] sm:$0xff]  ;;  %v197_v44 = vld [vmem:[#allocation8 + $0x30] sm:$0xff] }
  0x37   :  { %110 = vmatprep.subr.mxu0 %v79_v15  ;;  %333 = vmatprep.subr.mxu1 %v205_v36  ;;  %v196_v45 = vld [vmem:[#allocation8 + $0x28] sm:$0xff]  ;;  %v195_v46 = vld [vmem:[#allocation8 + $0x20] sm:$0xff]  ;;  %v194_v47 = vld [vmem:[#allocation8 + $0x18] sm:$0xff] }
  0x38   :  { %111 = vmatpush1.msra.mxu0 %v78_v16  ;;  %334 = vmatpush3.msra.mxu1 %v205_v36  ;;  %v193_v48 = vld [vmem:[#allocation8 + $0x10] sm:$0xff]  ;;  %v192_v49 = vld [vmem:[#allocation8 + $0x8] sm:$0xff]  ;;  %v191_v50 = vld [vmem:[#allocation8] sm:$0xff] }
  0x39   :  { %112 = vmatprep.subr.mxu0 %v77_v17  ;;  %335 = vmatprep.subr.mxu1 %v204_v37 }
  0x3a   :  { %113 = vmatpush1.msra.mxu0 %v76_v18  ;;  %336 = vmatpush3.msra.mxu1 %v204_v37 }
  0x3b   :  { %114 = vmatprep.subr.mxu0 %v75_v19  ;;  %337 = vmatprep.subr.mxu1 %v203_v38 }
  0x3c   :  { %115 = vmatpush1.msra.mxu0 %v74_v20  ;;  %338 = vmatpush3.msra.mxu1 %v203_v38 }
  0x3d   :  { %116 = vmatprep.subr.mxu0 %v73_v21  ;;  %339 = vmatprep.subr.mxu1 %v202_v39 }
  0x3e   :  { %117 = vmatpush1.msra.mxu0 %v72_v22  ;;  %340 = vmatpush3.msra.mxu1 %v202_v39 }
  0x3f   :  { %118 = vmatprep.subr.mxu0 %v71_v23  ;;  %341 = vmatprep.subr.mxu1 %v201_v40 }
  0x40   :  { %119 = vmatpush1.msra.mxu0 %v70_v24  ;;  %342 = vmatpush3.msra.mxu1 %v201_v40 }
  0x41   :  { %120 = vmatprep.subr.mxu0 %v69_v25  ;;  %343 = vmatprep.subr.mxu1 %v200_v41 }
  0x42   :  { %121 = vmatpush1.msra.mxu0 %v68_v26  ;;  %344 = vmatpush3.msra.mxu1 %v200_v41 }
  0x43   :  { %122 = vmatprep.subr.mxu0 %v67_v27  ;;  %345 = vmatprep.subr.mxu1 %v199_v42 }
  0x44   :  { %123 = vmatpush1.msra.mxu0 %v66_v28  ;;  %346 = vmatpush3.msra.mxu1 %v199_v42 }
  0x45   :  { %124 = vmatprep.subr.mxu0 %v65_v29  ;;  %347 = vmatprep.subr.mxu1 %v198_v43 }
  0x46   :  { %125 = vmatpush1.msra.mxu0 %v64_v30  ;;  %348 = vmatpush3.msra.mxu1 %v198_v43 }
  0x47   :  { %126 = vmatprep.subr.mxu0 %v63_v31  ;;  %349 = vmatprep.subr.mxu1 %v197_v44 }
  0x48   :  { %127 = vmatpush1.msra.mxu0 %v62_v32  ;;  %350 = vmatpush3.msra.mxu1 %v197_v44 }
  0x49   :  { %161 = vmatmul.mubr.f32.vlgmr.msra.gmra.mxu0 %v94_v33  ;;  %351 = vmatprep.subr.mxu1 %v196_v45 }
  0x4a   :  { %166 = vmatprep.mubr.f32.mxu0 %v476_v0  ;;  %352 = vmatpush3.msra.mxu1 %v196_v45 }
  0x4b   :  { %353 = vmatprep.subr.mxu1 %v195_v46 }
  0x4c   :  { %354 = vmatpush3.msra.mxu1 %v195_v46 }
  0x4d   :  { %167 = vmatmul.mubr.f32.gmra.mxu0 %v95_v34  ;;  %355 = vmatprep.subr.mxu1 %v194_v47 }
  0x4e   :  { %356 = vmatpush3.msra.mxu1 %v194_v47 }
  0x4f   :  { %357 = vmatprep.subr.mxu1 %v193_v48 }
  0x50   :  { %358 = vmatpush3.msra.mxu1 %v193_v48 }
  0x51   :  { %359 = vmatprep.subr.mxu1 %v192_v49 }
  0x52   :  { %360 = vmatpush3.msra.mxu1 %v192_v49 }
  0x53   :  { %361 = vmatprep.subr.mxu1 %v191_v50 }
  0x54   :  { %362 = vmatpush3.msra.mxu1 %v191_v50 }
 0x109   :  { %v162_v51 = vpop.f32.mrf.mxu0 }
 0x10a   :  { %v311_v52 = vmul.f32 -1.442695, %v162_v51 }
 0x10b   :  { %v164_v53 = vpop.f32.mrf.mxu0 }
 0x10c   :  { %375 = vpow2.f32 %v311_v52 }
 0x10d   :  { %v168_v54 = vpop.f32.mrf.mxu0 }
 0x10e   :  { %v312_v55 = vmul.f32 -1.442695, %v168_v54 }
 0x10f   :  { %v170_v1 = vpop.f32.mrf.mxu0 }
 0x110   :  { %377 = vpow2.f32 %v312_v55 }
 0x119   :  { %v376_v56 = vpop.eup %375 }
 0x11a   :  { %v179_v57 = vadd.f32 1.0, %v376_v56 }
 0x11c   :  { %379 = vrcp.f32 %v179_v57 }
 0x11d   :  { %v378_v58 = vpop.eup %377 }
 0x11e   :  { %v180_v59 = vadd.f32 1.0, %v378_v58 }
 0x120   :  { %381 = vrcp.f32 %v180_v59 }
 0x129   :  { %v380_v60 = vpop.eup %379 }
 0x12a   :  { %v185_v61 = vmul.f32 %v380_v60, %v162_v51 }
 0x12c   :  { %v187_v62 = vmul.f32 %v185_v61, %v164_v53 }
 0x12d   :  { %v382_v63 = vpop.eup %381 }
 0x12e   :  { %v186_v0 = vmul.f32 %v382_v63, %v168_v54  ;;  %363 = vmatprep.mubr.f32.mxu1 %v187_v62 }
 0x130   :  { %v188_v2 = vmul.f32 %v186_v0, %v170_v1 }
 0x132   :  { %364 = vmatmul.mubr.f32.vlgmr.msra.gmra.mxu1 %v188_v2 }
 0x1f2   :  { %v365_v3 = vpop.f32.mrf.mxu1 }
 0x1f3   :  { %292 = vst [vmem:[#allocation9 + $0x8] sm:$0xff] %v365_v3 }
 0x1f4   :  { %v273_v4 = vpop.f32.mrf.mxu1 }
 0x1f5   :  { %291 = vst [vmem:[#allocation9] sm:$0xff] %v273_v4 }
 0x1f6   :  { %454 = shalt.err (!%p451_p5)
}
 0x1f7   :  { %304 = dma.vmem_to_hbm [thread:$0]  %s299_s2, 256, %s524_s3, [#allocation5], %s473_s22, %s473_s22, %s474_s23  }
 0x1f8   :  { %467 = dma.done.wait [#allocation5], 256  }
 0x1f9   :  { %468 = vsyncadd [#allocation5], 4294967040 }
 0x1fa   :  { %308 = vsyncpa [#allocation4], 1 }
 0x1fb   :  { %309 = vsyncpa [#allocation7], 1 }
 0x1fc   :  { %310 = vsyncpa [#allocation5], 1 }

</bundles_post_ra>
